<compile_context>
chip_gen: v7x
topology: tpu7x:2x2x1
jax: 0.10.0
libtpu: 0.0.40
codegen_flags: <defaults>
</compile_context>

<pallas_src>
import jax
import jax.numpy as jnp
from jax.experimental import pallas as pl
from jax.experimental.pallas import tpu as pltpu


_EPS = 1e-5
_LANE = 128  # lane width: feature dims / output are padded to this


def _round_up(x, m):
    return ((x + m - 1) // m) * m


# ----------------------------- Pallas kernel -------------------------------

def _make_fused_kernel(meta):
    """Fused: [input-BN folded] -> L x (GCNConv + BN + ReLU) -> Linear.

    All parameters live in one f32 slab `p_ref` ([slab_rows, 128]); they are
    unpacked with static slices (zero runtime cost).
    """
    n_layers = meta["n_layers"]
    h_pad = meta["h_pad"]

    def kernel(a_ref, x_ref, p_ref, o_ref):
        a = a_ref[...]                                   # f32 [N, N]
        x = x_ref[...]                                   # f32 [N, f_pad]

        for l in range(n_layers):
            # X @ W on the MXU (f32 operands, f32 accumulation)
            w = p_ref[pl.ds(meta["w_off"][l], meta["w_rows"][l]), :]
            xw = jnp.dot(x, w, preferred_element_type=jnp.float32)
            if l == 0:
                # exact fold of the input-BN shift: (shift_in @ W0) added to
                # every row *before* the A_hat aggregation.
                xw = xw + p_ref[pl.ds(meta["pb0_row"], 1), :]

            # A_hat @ (X W) on the MXU
            agg = jnp.dot(a, xw, preferred_element_type=jnp.float32)

            # folded (GCN bias + eval BatchNorm) affine, then ReLU.
            # Dropout(p=0.5) is identity in eval mode.
            s = p_ref[pl.ds(meta["scale_rows"][l], 1), :]
            t = p_ref[pl.ds(meta["shift_rows"][l], 1), :]
            x = jnp.maximum(agg * s + t, 0.0)

        # final Linear(H -> 1), lane-dense padded to [N, 128] (column 0 real)
        lw = p_ref[pl.ds(meta["lin_w_off"], h_pad), :]
        lb = p_ref[pl.ds(meta["lin_b_row"], 1), :]
        o_ref[...] = jnp.dot(x, lw, preferred_element_type=jnp.float32) + lb

    return kernel


# ------------------------------ wrapper ------------------------------------

def make_forward(meta):
    """Build a jitted forward: (slab, a_hat, x_static, x_dynamic) -> [N]."""
    kernel = _make_fused_kernel(meta)
    f_pad = meta["f_pad"]
    slab_rows = meta["slab_rows"]

    def _full_spec(shape):
        return pl.BlockSpec(shape, lambda i, _s=shape: (0,) * len(_s))

    @jax.jit
    def forward(slab, a_hat, x_static, x_dynamic):
        n = x_static.shape[0]
        x = jnp.concatenate(
            [x_static, x_dynamic.reshape(n, -1)], axis=1).astype(jnp.float32)
        # lane-dense pad of the concatenated feature dim
        x_pad = jnp.zeros((n, f_pad), jnp.float32).at[:, :x.shape[1]].set(x)
        a = a_hat.astype(jnp.float32)

        out = pl.pallas_call(
            kernel,
            grid=(1,),
            out_shape=jax.ShapeDtypeStruct((n, _LANE), jnp.float32),
            in_specs=[_full_spec(a.shape),
                      _full_spec((n, f_pad)),
                      _full_spec((slab_rows, _LANE))],
            out_specs=_full_spec((n, _LANE)),
            compiler_params=pltpu.CompilerParams(
                dimension_semantics=("arbitrary",)),
        )(a, x_pad, slab)
        return out[:, 0]

    return forward


# --------------------------- glue / param setup -----------------------------

def fold_bn(gamma, beta, mean, var, bias=None):
    """Fold eval-mode BatchNorm (+ optional preceding bias) into scale/shift."""
    inv = gamma / jnp.sqrt(var + _EPS)
    if bias is None:
        shift = beta - mean * inv
    else:
        shift = (bias - mean) * inv + beta
    return inv.astype(jnp.float32), shift.astype(jnp.float32)


def gcn_norm_dense(edge_index, edge_weight, num_nodes):
    """Dense D^-1/2 (A + I) D^-1/2, matching torch_geometric gcn_norm."""
    src, dst = edge_index[0], edge_index[1]
    a = jnp.zeros((num_nodes, num_nodes), jnp.float32)
    a = a.at[dst, src].add(edge_weight)            # message: source -> target
    a = a + jnp.eye(num_nodes, dtype=jnp.float32)  # self loops, weight 1.0
    deg = a.sum(axis=1)
    # guard isolated nodes (deg == 0) like PyG's gcn_norm (inf -> 0)
    dinv = jnp.where(deg > 0, jax.lax.rsqrt(jnp.where(deg > 0, deg, 1.0)), 0.0)
    return a * dinv[:, None] * dinv[None, :]


def prepare_params(params):
    """One-time constant folding + packing of ALL parameters into one slab.

    Returns (slab [slab_rows, 128] f32, meta dict of static Python ints).
    """
    gcn = params["gcn"]
    n_layers = len(gcn)
    combined = int(gcn[0]["W"].shape[0])
    hidden = int(gcn[0]["W"].shape[1])
    assert hidden <= _LANE  # TODO(synk): widen slab / tile lanes for hidden > 128
    f_pad = _round_up(combined, _LANE)
    h_pad = _round_up(hidden, _LANE)

    # Fold eval-mode input BN into layer-0 weight + a pre-aggregation bias row:
    #   (x*s_in + t_in) @ W0 = x @ (s_in[:,None]*W0) + (t_in @ W0)
    bn = params["in_bn"]
    s_in, t_in = fold_bn(bn["gamma"], bn["beta"], bn["mean"], bn["var"])

    # slab layout (rows, all width 128):
    #   [W_0 (f_pad) | W_1..W_{L-1} (h_pad each) | lin_w (h_pad) |
    #    pre_bias0 | scale_0 shift_0 ... scale_{L-1} shift_{L-1} | lin_b | pad]
    w_off, w_rows, cur = [], [], 0
    for l in range(n_layers):
        rows = f_pad if l == 0 else h_pad
        w_off.append(cur)
        w_rows.append(rows)
        cur += rows
    lin_w_off = cur
    cur += h_pad
    pb0_row = cur
    scale_rows = [pb0_row + 1 + 2 * l for l in range(n_layers)]
    shift_rows = [pb0_row + 2 + 2 * l for l in range(n_layers)]
    lin_b_row = pb0_row + 1 + 2 * n_layers
    slab_rows = _round_up(lin_b_row + 1, 8)

    slab = jnp.zeros((slab_rows, _LANE), jnp.float32)
    pre_bias0 = None
    for l, layer in enumerate(gcn):
        w = layer["W"].astype(jnp.float32)
        if l == 0:
            pre_bias0 = t_in @ w                    # exact, kept in f32
            w = s_in[:, None] * w                   # exact, kept in f32
        scale, shift = fold_bn(layer["bn"]["gamma"], layer["bn"]["beta"],
                               layer["bn"]["mean"], layer["bn"]["var"],
                               bias=layer["b"])
        slab = slab.at[w_off[l]:w_off[l] + w.shape[0], :hidden].set(w)
        slab = slab.at[scale_rows[l], :hidden].set(scale)
        slab = slab.at[shift_rows[l], :hidden].set(shift)
    slab = slab.at[pb0_row, :hidden].set(pre_bias0)
    slab = slab.at[lin_w_off:lin_w_off + hidden, 0].set(
        params["lin_w"][:, 0].astype(jnp.float32))
    slab = slab.at[lin_b_row, 0].set(params["lin_b"][0].astype(jnp.float32))

    meta = dict(n_layers=n_layers, combined=combined, hidden=hidden,
                f_pad=f_pad, h_pad=h_pad, w_off=w_off, w_rows=w_rows,
                lin_w_off=lin_w_off, pb0_row=pb0_row, scale_rows=scale_rows,
                shift_rows=shift_rows, lin_b_row=lin_b_row,
                slab_rows=slab_rows)
    return slab, meta


def init_params(key, static_dim, dynamic_dim, seq_len, hidden_dim, n_layers):
    combined = static_dim + dynamic_dim * seq_len
    keys = jax.random.split(key, 4 + 6 * n_layers)
    ki = iter(keys)

    def bn_params(k, dim):
        k1, k2, k3, k4 = jax.random.split(k, 4)
        return dict(
            gamma=jax.random.normal(k1, (dim,)) * 0.1 + 1.0,
            beta=jax.random.normal(k2, (dim,)) * 0.1,
            mean=jax.random.normal(k3, (dim,)) * 0.1,
            var=jnp.abs(jax.random.normal(k4, (dim,))) * 0.1 + 0.5,
        )

    params = dict(in_bn=bn_params(next(ki), combined), gcn=[])
    fin = combined
    for _ in range(n_layers):
        kw, kb, kbn = next(ki), next(ki), next(ki)
        params["gcn"].append(dict(
            W=jax.random.normal(kw, (fin, hidden_dim)) * (1.0 / jnp.sqrt(fin)),
            b=jax.random.normal(kb, (hidden_dim,)) * 0.05,
            bn=bn_params(kbn, hidden_dim),
        ))
        fin = hidden_dim
    params["lin_w"] = jax.random.normal(next(ki), (hidden_dim, 1)) * 0.1
    params["lin_b"] = jax.random.normal(next(ki), (1,)) * 0.05
    # TODO(synk): feature_combiner fallback branch (empty edge_index or zero
    # GCN layers) is not exercised here; main GCN path implemented.
    return params


def reference_forward(params, x_static, x_dynamic, a_hat):
    """Pure f32 JAX reference of the original PyTorch eval-mode forward."""
    hp = jax.lax.Precision.HIGHEST
    n = x_static.shape[0]
    x = jnp.concatenate([x_static, x_dynamic.reshape(n, -1)], axis=1)
    bn = params["in_bn"]
    x = (x - bn["mean"]) / jnp.sqrt(bn["var"] + _EPS) * bn["gamma"] + bn["beta"]
    for layer in params["gcn"]:
        y = jnp.dot(a_hat, jnp.dot(x, layer["W"], precision=hp),
                    precision=hp) + layer["b"]
        lbn = layer["bn"]
        y = (y - lbn["mean"]) / jnp.sqrt(lbn["var"] + _EPS) * lbn["gamma"] \
            + lbn["beta"]
        x = jnp.maximum(y, 0.0)
    return (jnp.dot(x, params["lin_w"], precision=hp) + params["lin_b"])[:, 0]


# --------------------------------- main -------------------------------------

if __name__ == "__main__":
    STATIC_DIM, DYN_DIM, SEQ_LEN, HIDDEN, LAYERS = 4, 4, 8, 32, 2
    N = 16  # nodes

    key = jax.random.PRNGKey(0)
    k_p, k_s, k_d, k_w = jax.random.split(key, 4)

    params = init_params(k_p, STATIC_DIM, DYN_DIM, SEQ_LEN, HIDDEN, LAYERS)

    x_static = jax.random.normal(k_s, (N, STATIC_DIM), jnp.float32)
    x_dynamic = jax.random.normal(k_d, (N, SEQ_LEN, DYN_DIM), jnp.float32)

    # deterministic ring graph (both directions), weighted edges
    idx = jnp.arange(N)
    src = jnp.concatenate([idx, (idx + 1) % N])
    dst = jnp.concatenate([(idx + 1) % N, idx])
    edge_index = jnp.stack([src, dst])                       # [2, 2N]
    edge_weight = jax.random.uniform(k_w, (2 * N,), jnp.float32, 0.1, 1.0)

    a_hat = gcn_norm_dense(edge_index, edge_weight, N)

    # one-time constant folding / packing (hoisted out of the per-call path)
    slab, meta = prepare_params(params)
    forward = make_forward(meta)

    out = forward(slab, a_hat, x_static, x_dynamic)
    out = jax.block_until_ready(out)

    ref = reference_forward(params, x_static, x_dynamic, a_hat)
    assert out.shape == (N,)
    # f32 operands on the MXU (no bf16 quantization) -> much tighter tolerance
    # than the previous bf16 version (was 5e-2).
    assert jnp.allclose(out, ref, rtol=2e-3, atol=2e-3), (out, ref)

    print("KERNEL_OK")
</pallas_src>

<mosaic_0001>
module attributes {stable_mosaic.version = 11 : i64} {
  func.func @kernel(%arg0: i32, %arg1: memref<16x16xf32, #tpu.memory_space<vmem>>, %arg2: memref<16x128xf32, #tpu.memory_space<vmem>>, %arg3: memref<392x128xf32, #tpu.memory_space<vmem>>, %arg4: memref<16x128xf32, #tpu.memory_space<vmem>>) attributes {dimension_semantics = [#tpu.dimension_semantics<arbitrary>], iteration_bounds = array<i64: 1>, scalar_prefetch = 0 : i64, scratch_operands = 0 : i64, tpu.core_type = #tpu.core_type<tc>, window_params = [{pipeline_mode = #tpu.pipeline_mode<synchronous>, transform_indices = @transform_0, window_bounds = array<i64: 16, 16>}, {pipeline_mode = #tpu.pipeline_mode<synchronous>, transform_indices = @transform_1, window_bounds = array<i64: 16, 128>}, {pipeline_mode = #tpu.pipeline_mode<synchronous>, transform_indices = @transform_2, window_bounds = array<i64: 392, 128>}, {pipeline_mode = #tpu.pipeline_mode<synchronous>, transform_indices = @transform_3, window_bounds = array<i64: 16, 128>}]} {
    %c0 = arith.constant 0 : index
    %c0_0 = arith.constant 0 : index
    %0 = vector.load %arg1[%c0, %c0_0] : memref<16x16xf32, #tpu.memory_space<vmem>>, vector<16x16xf32>
    %c0_1 = arith.constant 0 : index
    %c0_2 = arith.constant 0 : index
    %1 = vector.load %arg2[%c0_1, %c0_2] : memref<16x128xf32, #tpu.memory_space<vmem>>, vector<16x128xf32>
    %c0_3 = arith.constant 0 : index
    %c0_4 = arith.constant 0 : index
    %2 = vector.load %arg3[%c0_3, %c0_4] : memref<392x128xf32, #tpu.memory_space<vmem>>, vector<128x128xf32>
    %cst = arith.constant dense<0.000000e+00> : vector<16x128xf32>
    %3 = tpu.matmul %1, %2, %cst {dimension_numbers = #tpu.dot_dimension_numbers<[1], [0], [0], [1], [0, 0, 1, 1], [], []>} : vector<16x128xf32>, vector<128x128xf32>, vector<16x128xf32> -> vector<16x128xf32>
    %c384 = arith.constant 384 : index
    %c0_5 = arith.constant 0 : index
    %4 = vector.load %arg3[%c384, %c0_5] : memref<392x128xf32, #tpu.memory_space<vmem>>, vector<1x128xf32>
    %5 = vector.broadcast %4 : vector<1x128xf32> to vector<16x128xf32>
    %6 = arith.addf %3, %5 : vector<16x128xf32>
    %cst_6 = arith.constant dense<0.000000e+00> : vector<16x128xf32>
    %7 = tpu.matmul %0, %6, %cst_6 {dimension_numbers = #tpu.dot_dimension_numbers<[1], [0], [0], [1], [0, 0, 1, 1], [], []>} : vector<16x16xf32>, vector<16x128xf32>, vector<16x128xf32> -> vector<16x128xf32>
    %c385 = arith.constant 385 : index
    %c0_7 = arith.constant 0 : index
    %8 = vector.load %arg3[%c385, %c0_7] : memref<392x128xf32, #tpu.memory_space<vmem>>, vector<1x128xf32>
    %c386 = arith.constant 386 : index
    %c0_8 = arith.constant 0 : index
    %9 = vector.load %arg3[%c386, %c0_8] : memref<392x128xf32, #tpu.memory_space<vmem>>, vector<1x128xf32>
    %10 = vector.broadcast %8 : vector<1x128xf32> to vector<16x128xf32>
    %11 = arith.mulf %7, %10 : vector<16x128xf32>
    %12 = vector.broadcast %9 : vector<1x128xf32> to vector<16x128xf32>
    %13 = arith.addf %11, %12 : vector<16x128xf32>
    %cst_9 = arith.constant 0.000000e+00 : f32
    %14 = vector.broadcast %cst_9 : f32 to vector<16x128xf32>
    %15 = arith.maximumf %13, %14 : vector<16x128xf32>
    %c128 = arith.constant 128 : index
    %c0_10 = arith.constant 0 : index
    %16 = vector.load %arg3[%c128, %c0_10] : memref<392x128xf32, #tpu.memory_space<vmem>>, vector<128x128xf32>
    %cst_11 = arith.constant dense<0.000000e+00> : vector<16x128xf32>
    %17 = tpu.matmul %15, %16, %cst_11 {dimension_numbers = #tpu.dot_dimension_numbers<[1], [0], [0], [1], [0, 0, 1, 1], [], []>} : vector<16x128xf32>, vector<128x128xf32>, vector<16x128xf32> -> vector<16x128xf32>
    %cst_12 = arith.constant dense<0.000000e+00> : vector<16x128xf32>
    %18 = tpu.matmul %0, %17, %cst_12 {dimension_numbers = #tpu.dot_dimension_numbers<[1], [0], [0], [1], [0, 0, 1, 1], [], []>} : vector<16x16xf32>, vector<16x128xf32>, vector<16x128xf32> -> vector<16x128xf32>
    %c387 = arith.constant 387 : index
    %c0_13 = arith.constant 0 : index
    %19 = vector.load %arg3[%c387, %c0_13] : memref<392x128xf32, #tpu.memory_space<vmem>>, vector<1x128xf32>
    %c388 = arith.constant 388 : index
    %c0_14 = arith.constant 0 : index
    %20 = vector.load %arg3[%c388, %c0_14] : memref<392x128xf32, #tpu.memory_space<vmem>>, vector<1x128xf32>
    %21 = vector.broadcast %19 : vector<1x128xf32> to vector<16x128xf32>
    %22 = arith.mulf %18, %21 : vector<16x128xf32>
    %23 = vector.broadcast %20 : vector<1x128xf32> to vector<16x128xf32>
    %24 = arith.addf %22, %23 : vector<16x128xf32>
    %cst_15 = arith.constant 0.000000e+00 : f32
    %25 = vector.broadcast %cst_15 : f32 to vector<16x128xf32>
    %26 = arith.maximumf %24, %25 : vector<16x128xf32>
    %c256 = arith.constant 256 : index
    %c0_16 = arith.constant 0 : index
    %27 = vector.load %arg3[%c256, %c0_16] : memref<392x128xf32, #tpu.memory_space<vmem>>, vector<128x128xf32>
    %c389 = arith.constant 389 : index
    %c0_17 = arith.constant 0 : index
    %28 = vector.load %arg3[%c389, %c0_17] : memref<392x128xf32, #tpu.memory_space<vmem>>, vector<1x128xf32>
    %cst_18 = arith.constant dense<0.000000e+00> : vector<16x128xf32>
    %29 = tpu.matmul %26, %27, %cst_18 {dimension_numbers = #tpu.dot_dimension_numbers<[1], [0], [0], [1], [0, 0, 1, 1], [], []>} : vector<16x128xf32>, vector<128x128xf32>, vector<16x128xf32> -> vector<16x128xf32>
    %30 = vector.broadcast %28 : vector<1x128xf32> to vector<16x128xf32>
    %31 = arith.addf %29, %30 : vector<16x128xf32>
    %c0_19 = arith.constant 0 : index
    %c0_20 = arith.constant 0 : index
    %32 = vector.load %arg4[%c0_19, %c0_20] : memref<16x128xf32, #tpu.memory_space<vmem>>, vector<16x128xf32>
    tpu.vector_store %arg4[%c0_19, %c0_20], %31 {strides = array<i32>} : memref<16x128xf32, #tpu.memory_space<vmem>>, vector<16x128xf32>,
    return
  }
  func.func @transform_0(%arg0: i32) -> (i32, i32) {
    %c0_i32 = arith.constant 0 : i32
    %c0_i32_0 = arith.constant 0 : i32
    %c0_i32_1 = arith.constant 0 : i32
    return %c0_i32, %c0_i32_0 : i32, i32
  }
  func.func @transform_1(%arg0: i32) -> (i32, i32) {
    %c0_i32 = arith.constant 0 : i32
    %c0_i32_0 = arith.constant 0 : i32
    %c0_i32_1 = arith.constant 0 : i32
    return %c0_i32, %c0_i32_0 : i32, i32
  }
  func.func @transform_2(%arg0: i32) -> (i32, i32) {
    %c0_i32 = arith.constant 0 : i32
    %c0_i32_0 = arith.constant 0 : i32
    %c0_i32_1 = arith.constant 0 : i32
    return %c0_i32, %c0_i32_0 : i32, i32
  }
  func.func @transform_3(%arg0: i32) -> (i32, i32) {
    %c0_i32 = arith.constant 0 : i32
    %c0_i32_0 = arith.constant 0 : i32
    %c0_i32_1 = arith.constant 0 : i32
    return %c0_i32, %c0_i32_0 : i32, i32
  }
}

</mosaic_0001>

<bundles_post_ra>
// kernel: forward.1
= control target key start
LH: loop header
LB: loop body
LE: loop exit
PB: predicated region body
PF: predicated region fallthrough
CT: control target
= control target key end

     0   :  { %8 = vsyncpa [#allocation3], 0  ;;  %s833_s12 = smov [#allocation2]   ;;  %s898_s0 = inlined_call_operand.vmem [shape: f32[16,16], index: 0, kind: input, shape index: {}]   ;;  %s899_s1 = inlined_call_operand.vmem [shape: f32[16,128], index: 1, kind: input, shape index: {}]   ;;  %s900_s2 = inlined_call_operand.hbm [shape: f32[392,128], index: 2, kind: input, shape index: {}]   ;;  %s901_s3 = inlined_call_operand.vmem [shape: f32[16,128], index: 3, kind: output, shape index: {}]  }
   0x1   :  { %s18_s13 = sshll.u32 %s833_s12, 4  ;;  %s809_s16 = scalar_lea.hbm %s900_s2, 6272  ;;  %s19_s13 = int_to_ptr.vmem [resolvable:$true] %s18_s13 }
   0x2   :  { %p810_p0 = scmp.ne.s32.totalorder %s900_s2, %s809_s16  ;;  %p813_p1 = scmp.lt.u32.totalorder %s809_s16, %s900_s2 }
   0x4   :  { %p815_p2 = pnand %p813_p1, %p810_p0 }
   0x6   :  { %818 = shalt.err (!%p815_p2)
}
   0x7   :  { %s819_s21 = scalar_lea.vmem %s19_s13, 6272  ;;  %p824_p4 = scmp.lt.s32.totalorder %s19_s13, %s19_s13 }
   0x8   :  { %p820_p3 = scmp.ne.s32.totalorder %s19_s13, %s819_s21  ;;  %p825_p5 = scmp.lt.s32.totalorder %s819_s21, %s819_s21 }
   0xa   :  { %p826_p6 = por %p825_p5, %p824_p4 }
   0xc   :  { %p827_p7 = pnand %p826_p6, %p820_p3 }
   0xe   :  { %830 = shalt.err (!%p827_p7)
}
   0xf   :  { %s834_s22 = smov 128   ;;  %s835_s23 = smov 8  }
  0x10   :  { %24 = dma.hbm_to_vmem [thread:$0]  %s900_s2, 6272, %s19_s13, [#allocation3], %s834_s22, %s834_s22, %s835_s23  }
  0x11   :  { %831 = dma.done.wait [#allocation3], 6272  }
  0x12   :  { %832 = vsyncadd [#allocation3], 4294961024  ;;  %v32_v0 = vld [vmem:[#allocation2] sm:$0xff]  ;;  %v33_v1 = vld [vmem:[#allocation2 + $0x8] sm:$0xff]  ;;  %vm128_vm0 = vcmask 130048  }
  0x13   :  { %v34_v2 = vld [vmem:[#allocation2 + $0x10] sm:$0xff]  ;;  %v702_v3 = vpack.c.bf16 %v33_v1, %v32_v0  ;;  %v35_v4 = vld [vmem:[#allocation2 + $0x18] sm:$0xff]  ;;  %v36_v6 = vld [vmem:[#allocation2 + $0x20] sm:$0xff] }
  0x14   :  { %v706_v5 = vpack.c.bf16 %v35_v4, %v34_v2  ;;  %v37_v7 = vld [vmem:[#allocation2 + $0x28] sm:$0xff]  ;;  %v30_v9 = vld [vmem:[%s899_s1] sm:$0xff]  ;;  %v38_v10 = vld [vmem:[#allocation2 + $0x30] sm:$0xff] }
  0x15   :  { %703 = vmatprep.subr.bf16.mxu0 %v702_v3  ;;  %v710_v8 = vpack.c.bf16 %v37_v7, %v36_v6  ;;  %v39_v11 = vld [vmem:[#allocation2 + $0x38] sm:$0xff]  ;;  %615 = vmatprep.mubr.f32.mxu0 %v30_v9  ;;  %v40_v13 = vld [vmem:[#allocation2 + $0x40] sm:$0xff]  ;;  %v41_v14 = vld [vmem:[#allocation2 + $0x48] sm:$0xff] }
  0x16   :  { %705 = vmatpush3.bf16.msra.mxu0 %v702_v3  ;;  %v714_v12 = vpack.c.bf16 %v39_v11, %v38_v10  ;;  %v718_v15 = vpack.c.bf16 %v41_v14, %v40_v13  ;;  %v42_v16 = vld [vmem:[#allocation2 + $0x50] sm:$0xff]  ;;  %v43_v17 = vld [vmem:[#allocation2 + $0x58] sm:$0xff]  ;;  %v44_v19 = vld [vmem:[#allocation2 + $0x60] sm:$0xff] }
  0x17   :  { %707 = vmatprep.subr.bf16.mxu0 %v706_v5  ;;  %v722_v18 = vpack.c.bf16 %v43_v17, %v42_v16  ;;  %v45_v20 = vld [vmem:[#allocation2 + $0x68] sm:$0xff]  ;;  %v46_v22 = vld [vmem:[#allocation2 + $0x70] sm:$0xff]  ;;  %v47_v23 = vld [vmem:[#allocation2 + $0x78] sm:$0xff] }
  0x18   :  { %v726_v21 = vpack.c.bf16 %v45_v20, %v44_v19  ;;  %v730_v24 = vpack.c.bf16 %v47_v23, %v46_v22  ;;  %v31_v25 = vld [vmem:[%s899_s1 + $0x8] sm:$0xff]  ;;  %v877_v26 = vld [vmem:[%s898_s0] sm:$0xff]  ;;  %v228_v36 = vld [vmem:[#allocation2 + $0x90] sm:$0xff] }
  0x19   :  { %622 = vmatprep.mubr.msk.f32.mxu1 %vm128_vm0, %v877_v26  ;;  %v511_v27 = vld [vmem:[#allocation2 + $0x180] ss:$0 sm:$0xff]  ;;  %v227_v32 = vld [vmem:[#allocation2 + $0x88] sm:$0xff]  ;;  %v229_v37 = vld [vmem:[#allocation2 + $0x98] sm:$0xff] }
  0x1a   :  { %709 = vmatpush3.bf16.msra.mxu0 %v706_v5  ;;  %v226_v31 = vld [vmem:[#allocation2 + $0x80] sm:$0xff]  ;;  %v884_v38 = vld [vmem:[%s898_s0 + $0x8] sm:$0xff]  ;;  %v742_v39 = vpack.c.bf16 %v229_v37, %v228_v36  ;;  %v232_v43 = vld [vmem:[#allocation2 + $0xb0] sm:$0xff] }
  0x1b   :  { %711 = vmatprep.subr.bf16.mxu0 %v710_v8  ;;  %v738_v35 = vpack.c.bf16 %v227_v32, %v226_v31  ;;  %v230_v40 = vld [vmem:[#allocation2 + $0xa0] sm:$0xff]  ;;  %v231_v41 = vld [vmem:[#allocation2 + $0xa8] sm:$0xff]  ;;  %v233_v44 = vld [vmem:[#allocation2 + $0xb8] sm:$0xff] }
  0x1c   :  { %v746_v42 = vpack.c.bf16 %v231_v41, %v230_v40  ;;  %v750_v45 = vpack.c.bf16 %v233_v44, %v232_v43  ;;  %v234_v46 = vld [vmem:[#allocation2 + $0xc0] sm:$0xff]  ;;  %v235_v47 = vld [vmem:[#allocation2 + $0xc8] sm:$0xff]  ;;  %v236_v49 = vld [vmem:[#allocation2 + $0xd0] sm:$0xff] }
  0x1d   :  { %v754_v48 = vpack.c.bf16 %v235_v47, %v234_v46  ;;  %v237_v50 = vld [vmem:[#allocation2 + $0xd8] sm:$0xff]  ;;  %v238_v52 = vld [vmem:[#allocation2 + $0xe0] sm:$0xff]  ;;  %v239_v53 = vld [vmem:[#allocation2 + $0xe8] sm:$0xff] }
  0x1e   :  { %713 = vmatpush3.bf16.msra.mxu0 %v710_v8  ;;  %v758_v51 = vpack.c.bf16 %v237_v50, %v236_v49  ;;  %v762_v54 = vpack.c.bf16 %v239_v53, %v238_v52  ;;  %v240_v55 = vld [vmem:[#allocation2 + $0xf0] sm:$0xff]  ;;  %v241_v56 = vld [vmem:[#allocation2 + $0xf8] sm:$0xff]  ;;  %v514_v58 = vld [vmem:[#allocation2 + $0x181] ss:$0 sm:$0xff] }
  0x1f   :  { %715 = vmatprep.subr.bf16.mxu0 %v714_v12  ;;  %v766_v57 = vpack.c.bf16 %v241_v56, %v240_v55  ;;  %v515_v60 = vld [vmem:[#allocation2 + $0x182] ss:$0 sm:$0xff]  ;;  %v409_v5 = vld [vmem:[#allocation2 + $0x108] sm:$0xff]  ;;  %v410_v6 = vld [vmem:[#allocation2 + $0x110] sm:$0xff] }
  0x20   :  { %v408_v4 = vld [vmem:[#allocation2 + $0x100] sm:$0xff]  ;;  %v411_v8 = vld [vmem:[#allocation2 + $0x118] sm:$0xff]  ;;  %v413_v11 = vld [vmem:[#allocation2 + $0x128] sm:$0xff] }
  0x21   :  { %v774_v7 = vpack.c.bf16 %v409_v5, %v408_v4  ;;  %v778_v9 = vpack.c.bf16 %v411_v8, %v410_v6  ;;  %v412_v10 = vld [vmem:[#allocation2 + $0x120] sm:$0xff]  ;;  %v414_v13 = vld [vmem:[#allocation2 + $0x130] sm:$0xff]  ;;  %v415_v14 = vld [vmem:[#allocation2 + $0x138] sm:$0xff] }
  0x22   :  { %717 = vmatpush3.bf16.msra.mxu0 %v714_v12  ;;  %v782_v12 = vpack.c.bf16 %v413_v11, %v412_v10  ;;  %v416_v16 = vld [vmem:[#allocation2 + $0x140] sm:$0xff]  ;;  %v417_v17 = vld [vmem:[#allocation2 + $0x148] sm:$0xff]  ;;  %v418_v19 = vld [vmem:[#allocation2 + $0x150] sm:$0xff] }
  0x23   :  { %719 = vmatprep.subr.bf16.mxu0 %v718_v15  ;;  %v419_v20 = vld [vmem:[#allocation2 + $0x158] sm:$0xff]  ;;  %v518_v31 = vld [vmem:[#allocation2 + $0x183] ss:$0 sm:$0xff]  ;;  %v520_v41 = vld [vmem:[#allocation2 + $0x185] ss:$0 sm:$0xff] }
  0x26   :  { %721 = vmatpush3.bf16.msra.mxu0 %v718_v15  ;;  %v786_v15 = vpack.c.bf16 %v415_v14, %v414_v13 }
  0x27   :  { %723 = vmatprep.subr.bf16.mxu0 %v722_v18 }
  0x2a   :  { %725 = vmatpush3.bf16.msra.mxu0 %v722_v18  ;;  %v790_v18 = vpack.c.bf16 %v417_v17, %v416_v16 }
  0x2b   :  { %727 = vmatprep.subr.bf16.mxu0 %v726_v21 }
  0x2e   :  { %729 = vmatpush3.bf16.msra.mxu0 %v726_v21  ;;  %v794_v21 = vpack.c.bf16 %v419_v20, %v418_v19 }
  0x2f   :  { %731 = vmatprep.subr.bf16.mxu0 %v730_v24 }
  0x32   :  { %733 = vmatpush3.bf16.msra.mxu0 %v730_v24 }
  0x33   :  { %775 = vmatprep.subr.bf16.mxu0 %v774_v7 }
  0x35   :  { %616 = vmatmul.mubr.f32.vlgmr.msra.gmra.mrb[0].mxu0 %v31_v25  ;;  %v420_v25 = vld [vmem:[#allocation2 + $0x160] sm:$0xff] }
  0x36   :  { %777 = vmatpush3.bf16.msra.mxu0 %v774_v7 }
  0x37   :  { %779 = vmatprep.subr.bf16.mxu0 %v778_v9 }
  0x3a   :  { %781 = vmatpush3.bf16.msra.mxu0 %v778_v9 }
  0x3b   :  { %783 = vmatprep.subr.bf16.mxu0 %v782_v12 }
  0x3e   :  { %785 = vmatpush3.bf16.msra.mxu0 %v782_v12 }
  0x3f   :  { %787 = vmatprep.subr.bf16.mxu0 %v786_v15 }
  0x42   :  { %789 = vmatpush3.bf16.msra.mxu0 %v786_v15 }
  0x43   :  { %791 = vmatprep.subr.bf16.mxu0 %v790_v18 }
  0x46   :  { %793 = vmatpush3.bf16.msra.mxu0 %v790_v18 }
  0x47   :  { %795 = vmatprep.subr.bf16.mxu0 %v794_v21 }
  0x4a   :  { %797 = vmatpush3.bf16.msra.mxu0 %v794_v21 }
 0x108   :  { %v617_v28 = vpop.f32.mrb[0].mxu0 }
 0x109   :  { %v125_v29 = vadd.f32 %v617_v28, %v511_v27  ;;  %v119_v30 = vpop.f32.mrb[1].mxu0  ;;  %v422_v28 = vld [vmem:[#allocation2 + $0x170] sm:$0xff] }
 0x10a   :  { %v120_v33 = vadd.f32 %v511_v27, %v119_v30 }
 0x10c   :  { %v734_v34 = vpack.c.bf16 %v125_v29, %v120_v33  ;;  %v423_v29 = vld [vmem:[#allocation2 + $0x178] sm:$0xff]  ;;  %v519_v33 = vld [vmem:[#allocation2 + $0x184] ss:$0 sm:$0xff] }
 0x10d   :  { %v802_v30 = vpack.c.bf16 %v423_v29, %v422_v28 }
 0x10e   :  { %735 = vmatprep.subr.bf16.mxu1 %v734_v34 }
 0x10f   :  { %737 = vmatpush3.bf16.msra.mxu1 %v734_v34 }
 0x110   :  { %739 = vmatprep.subr.bf16.mxu1 %v738_v35 }
 0x112   :  { %623 = vmatmul.mubr.msk.f32.vlgmr.msra.gmra.mrb[0].mxu1 %vm128_vm0, %v884_v38 }
 0x113   :  { %741 = vmatpush3.bf16.msra.mxu1 %v738_v35 }
 0x114   :  { %743 = vmatprep.subr.bf16.mxu1 %v742_v39 }
 0x117   :  { %745 = vmatpush3.bf16.msra.mxu1 %v742_v39 }
 0x118   :  { %747 = vmatprep.subr.bf16.mxu1 %v746_v42 }
 0x11b   :  { %749 = vmatpush3.bf16.msra.mxu1 %v746_v42 }
 0x11c   :  { %751 = vmatprep.subr.bf16.mxu1 %v750_v45 }
 0x11f   :  { %753 = vmatpush3.bf16.msra.mxu1 %v750_v45 }
 0x120   :  { %755 = vmatprep.subr.bf16.mxu1 %v754_v48 }
 0x123   :  { %757 = vmatpush3.bf16.msra.mxu1 %v754_v48 }
 0x124   :  { %759 = vmatprep.subr.bf16.mxu1 %v758_v51 }
 0x127   :  { %761 = vmatpush3.bf16.msra.mxu1 %v758_v51 }
 0x128   :  { %763 = vmatprep.subr.bf16.mxu1 %v762_v54 }
 0x12b   :  { %765 = vmatpush3.bf16.msra.mxu1 %v762_v54 }
 0x12c   :  { %767 = vmatprep.subr.bf16.mxu1 %v766_v57 }
 0x12f   :  { %769 = vmatpush3.bf16.msra.mxu1 %v766_v57 }
 0x1e5   :  { %v624_v59 = vpop.f32.mrb[0].mxu1 }
 0x1e6   :  { %v217_v61 = vmul.f32 %v624_v59, %v514_v58  ;;  %v201_v62 = vpop.f32.mrb[1].mxu1 }
 0x1e7   :  { %v216_v63 = vmul.f32 %v514_v58, %v201_v62 }
 0x1e8   :  { %v223_v0 = vadd.f32 %v515_v60, %v217_v61 }
 0x1e9   :  { %v222_v1 = vadd.f32 %v515_v60, %v216_v63 }
 0x1ea   :  { %v225_v3 = vmax.f32 %v223_v0, 0.0 }
 0x1eb   :  { %v224_v2 = vmax.f32 %v222_v1, 0.0 }
 0x1ed   :  { %657 = vmatprep.mubr.f32.mxu1 %v224_v2 }
 0x1ee   :  { %658 = vmatmul.mubr.f32.vlgmr.msra.gmra.mrb[2].mxu1 %v225_v3 }
 0x1ef   :  { %664 = vmatprep.mubr.msk.f32.mxu1 %vm128_vm0, %v877_v26  ;;  %v421_v26 = vld [vmem:[#allocation2 + $0x168] sm:$0xff] }
 0x1f0   :  { %v798_v27 = vpack.c.bf16 %v421_v26, %v420_v25 }
 0x1f2   :  { %799 = vmatprep.subr.bf16.mxu0 %v798_v27 }
 0x1f3   :  { %801 = vmatpush3.bf16.msra.mxu0 %v798_v27 }
 0x1f4   :  { %803 = vmatprep.subr.bf16.mxu0 %v802_v30 }
 0x1f7   :  { %805 = vmatpush3.bf16.msra.mxu0 %v802_v30 }
 0x2c1   :  { %v659_v22 = vpop.f32.mrb[2].mxu1 }
 0x2c2   :  { %v308_v23 = vpop.f32.mrb[3].mxu1 }
 0x2c3   :  { %v770_v24 = vpack.c.bf16 %v659_v22, %v308_v23 }
 0x2c5   :  { %771 = vmatprep.subr.bf16.mxu1 %v770_v24 }
 0x2c6   :  { %773 = vmatpush3.bf16.msra.mxu1 %v770_v24 }
 0x2c9   :  { %665 = vmatmul.mubr.msk.f32.vlgmr.msra.gmra.mrb[4].mxu1 %vm128_vm0, %v884_v38 }
 0x39c   :  { %v666_v32 = vpop.f32.mrb[4].mxu1 }
 0x39d   :  { %v399_v34 = vmul.f32 %v666_v32, %v518_v31  ;;  %v383_v35 = vpop.f32.mrb[5].mxu1 }
 0x39e   :  { %v398_v36 = vmul.f32 %v518_v31, %v383_v35 }
 0x39f   :  { %v405_v37 = vadd.f32 %v519_v33, %v399_v34 }
 0x3a0   :  { %v404_v39 = vadd.f32 %v519_v33, %v398_v36 }
 0x3a1   :  { %v407_v38 = vmax.f32 %v405_v37, 0.0 }
 0x3a2   :  { %v406_v40 = vmax.f32 %v404_v39, 0.0 }
 0x3a4   :  { %699 = vmatprep.mubr.f32.mxu0 %v406_v40 }
 0x3a5   :  { %700 = vmatmul.mubr.f32.vlgmr.msra.gmra.mrb[2].mxu0 %v407_v38 }
 0x478   :  { %v701_v42 = vpop.f32.mrb[2].mxu0 }
 0x479   :  { %v501_v43 = vadd.f32 %v701_v42, %v520_v41  ;;  %v495_v44 = vpop.f32.mrb[3].mxu0 }
 0x47a   :  { %v496_v45 = vadd.f32 %v520_v41, %v495_v44 }
 0x47b   :  { %505 = vst [vmem:[%s901_s3 + $0x8] sm:$0xff] %v501_v43 }
 0x47c   :  { %504 = vst [vmem:[%s901_s3] sm:$0xff] %v496_v45 }
 0x47d   :  { %510 = vsyncpa [#allocation3], 1 }

</bundles_post_ra>
